<compile_context>
chip_gen: v7x
topology: tpu7x:2x2x1
jax: 0.10.0
libtpu: 0.0.40
codegen_flags: <defaults>
</compile_context>

<pallas_src>
import jax
import jax.numpy as jnp
from jax import lax
from jax.experimental import pallas as pl
from jax.experimental.pallas import tpu as pltpu

LAYER_DIMS = [(61, 35), (35, 50), (50, 35), (35, 50), (50, 30), (30, 17)]
IN_FEATURES = LAYER_DIMS[0][0]
OUT_FEATURES = LAYER_DIMS[-1][1]


def _cdiv(a, b):
    return (a + b - 1) // b


def _round_up(n, m):
    return _cdiv(n, m) * m


def _mlp_kernel(x_ref, *refs):
    """x_ref: [tile_b, 61]; refs = (w1, b1, ..., w6, b6, o_ref).

    Weights are PyTorch-layout [out, in] (matmul dtype); biases are [out, 1]
    f32.  Activations live as [features, tile_b] so batch sits on lanes and
    the final [17, tile_b] store is lane-dense.
    """
    o_ref = refs[-1]
    wb = refs[:-1]
    n_layers = len(wb) // 2

    w1 = wb[0][...]
    b1 = wb[1][...]
    # First layer folds the batch transpose into the matmul (A @ B^T form):
    # contract W1's dim 1 (in-features) with x's dim 1 (features) -> [35, tile_b].
    h = lax.dot_general(
        w1, x_ref[...],
        dimension_numbers=(((1,), (1,)), ((), ())),
        preferred_element_type=jnp.float32)
    h = jnp.maximum(h + b1, 0.0)                       # f32 bias add + ReLU

    for layer in range(1, n_layers):
        w = wb[2 * layer][...]
        b = wb[2 * layer + 1][...]
        z = jnp.dot(w, h.astype(w.dtype),
                    preferred_element_type=jnp.float32) + b
        h = jnp.maximum(z, 0.0) if layer < n_layers - 1 else z

    o_ref[...] = h.astype(o_ref.dtype)


def mlp_forward(x, params, *, tile_max=8192, matmul_dtype=jnp.bfloat16):
    """x: [B, 61] float32; params: list of (W [out, in], b [out, 1]) f32 pairs.

    Returns [B, 17] float32 logits.
    """
    B, F = x.shape
    assert F == IN_FEATURES, x.shape

    # Tiling policy:
    #   * at most `tile_max` samples per tile (amortizes per-step overhead
    #     while staying well inside the default scoped-VMEM budget),
    #   * >= 2 grid steps when B > 128 so the "parallel" batch axis can be
    #     sharded across v7x's two TensorCores,
    #   * padding limited to < n_tiles * 128 rows (no near-full-tile waste).
    n_tiles = max(_cdiv(B, tile_max), min(2, _cdiv(B, 128)))
    tile_b = _round_up(_cdiv(B, n_tiles), 128)
    b_pad = n_tiles * tile_b

    x_p = x if b_pad == B else jnp.pad(x, ((0, b_pad - B), (0, 0)))
    x_p = x_p.astype(matmul_dtype)        # halves streamed x bytes when bf16

    # TODO(synk): in a real deployment pre-cast the weights once outside the
    # per-call wrapper instead of casting on every invocation.
    flat = []
    in_specs = [pl.BlockSpec((tile_b, IN_FEATURES), lambda i: (i, 0))]
    for w, b in params:
        w_c = w.astype(matmul_dtype)
        b_c = b.astype(jnp.float32)       # bias add / ReLU stay f32 (v5e VPU)
        flat.extend([w_c, b_c])
        # Constant index_map -> weights/biases stay VMEM-resident across steps.
        in_specs.append(pl.BlockSpec(w_c.shape, lambda i: (0, 0)))
        in_specs.append(pl.BlockSpec(b_c.shape, lambda i: (0, 0)))

    out_t = pl.pallas_call(
        _mlp_kernel,
        out_shape=jax.ShapeDtypeStruct((OUT_FEATURES, b_pad), jnp.float32),
        grid=(n_tiles,),
        in_specs=in_specs,
        out_specs=pl.BlockSpec((OUT_FEATURES, tile_b), lambda i: (0, i)),
        compiler_params=pltpu.CompilerParams(
            dimension_semantics=("parallel",)),
    )(x_p, *flat)

    return out_t[:, :B].T                 # back to [B, 17]


def init_params(key):
    """Deterministic init mirroring nn.Linear default (uniform +-1/sqrt(fan_in)).

    Weights kept in PyTorch layout [out, in]; biases as [out, 1].
    """
    params = []
    for (fan_in, fan_out) in LAYER_DIMS:
        key, kw, kb = jax.random.split(key, 3)
        bound = 1.0 / (fan_in ** 0.5)
        w = jax.random.uniform(kw, (fan_out, fan_in), jnp.float32, -bound, bound)
        b = jax.random.uniform(kb, (fan_out, 1), jnp.float32, -bound, bound)
        params.append((w, b))
    return params


def reference_forward(x, params, matmul_dtype=None):
    """Pure-JAX reference in [batch, features] layout.

    If matmul_dtype is given, matmul operands are cast to it (f32 accumulate,
    f32 elementwise) to mirror the kernel's precision exactly.
    """
    h = x
    for i, (w, b) in enumerate(params):
        if matmul_dtype is not None:
            z = jnp.dot(h.astype(matmul_dtype), w.astype(matmul_dtype).T,
                        preferred_element_type=jnp.float32)
        else:
            z = h @ w.T
        z = z + b.reshape(1, -1)
        h = jnp.maximum(z, 0.0) if i < len(params) - 1 else z
    return h


if __name__ == "__main__":
    key = jax.random.PRNGKey(0)
    key, kx1, kx2 = jax.random.split(key, 3)
    params = init_params(key)

    # Small single-tile batch.
    x_small = jax.random.normal(kx1, (8, IN_FEATURES), jnp.float32)
    out_small = jax.block_until_ready(mlp_forward(x_small, params))
    assert out_small.shape == (8, OUT_FEATURES), out_small.shape
    ref_match = reference_forward(x_small, params, matmul_dtype=jnp.bfloat16)
    assert jnp.allclose(out_small, ref_match, atol=1e-3, rtol=1e-3), \
        "mismatch vs precision-matched reference"
    ref_f32 = reference_forward(x_small, params)
    assert jnp.allclose(out_small, ref_f32, atol=5e-2, rtol=5e-2), \
        "mismatch vs f32 reference"

    # Multi-tile / padded batch path (exercises grid=(2,), padding + slicing).
    x_big = jax.random.normal(kx2, (300, IN_FEATURES), jnp.float32)
    out_big = jax.block_until_ready(mlp_forward(x_big, params))
    assert out_big.shape == (300, OUT_FEATURES), out_big.shape
    ref_big = reference_forward(x_big, params, matmul_dtype=jnp.bfloat16)
    assert jnp.allclose(out_big, ref_big, atol=1e-3, rtol=1e-3), \
        "mismatch vs precision-matched reference (multi-tile)"

    print("KERNEL_OK")
</pallas_src>

<mosaic_0001>
module attributes {stable_mosaic.version = 11 : i64} {
  func.func @_mlp_kernel(%arg0: i32, %arg1: memref<128x61xbf16, #tpu.memory_space<vmem>>, %arg2: memref<35x61xbf16, #tpu.memory_space<vmem>>, %arg3: memref<35x1xf32, #tpu.memory_space<vmem>>, %arg4: memref<50x35xbf16, #tpu.memory_space<vmem>>, %arg5: memref<50x1xf32, #tpu.memory_space<vmem>>, %arg6: memref<35x50xbf16, #tpu.memory_space<vmem>>, %arg7: memref<35x1xf32, #tpu.memory_space<vmem>>, %arg8: memref<50x35xbf16, #tpu.memory_space<vmem>>, %arg9: memref<50x1xf32, #tpu.memory_space<vmem>>, %arg10: memref<30x50xbf16, #tpu.memory_space<vmem>>, %arg11: memref<30x1xf32, #tpu.memory_space<vmem>>, %arg12: memref<17x30xbf16, #tpu.memory_space<vmem>>, %arg13: memref<17x1xf32, #tpu.memory_space<vmem>>, %arg14: memref<17x128xf32, #tpu.memory_space<vmem>>) attributes {dimension_semantics = [#tpu.dimension_semantics<parallel>], iteration_bounds = array<i64: 1>, scalar_prefetch = 0 : i64, scratch_operands = 0 : i64, tpu.core_type = #tpu.core_type<tc>, window_params = [{transform_indices = @transform_0, window_bounds = array<i64: 128, 61>}, {pipeline_mode = #tpu.pipeline_mode<synchronous>, transform_indices = @transform_1, window_bounds = array<i64: 35, 61>}, {pipeline_mode = #tpu.pipeline_mode<synchronous>, transform_indices = @transform_2, window_bounds = array<i64: 35, 1>}, {pipeline_mode = #tpu.pipeline_mode<synchronous>, transform_indices = @transform_3, window_bounds = array<i64: 50, 35>}, {pipeline_mode = #tpu.pipeline_mode<synchronous>, transform_indices = @transform_4, window_bounds = array<i64: 50, 1>}, {pipeline_mode = #tpu.pipeline_mode<synchronous>, transform_indices = @transform_5, window_bounds = array<i64: 35, 50>}, {pipeline_mode = #tpu.pipeline_mode<synchronous>, transform_indices = @transform_6, window_bounds = array<i64: 35, 1>}, {pipeline_mode = #tpu.pipeline_mode<synchronous>, transform_indices = @transform_7, window_bounds = array<i64: 50, 35>}, {pipeline_mode = #tpu.pipeline_mode<synchronous>, transform_indices = @transform_8, window_bounds = array<i64: 50, 1>}, {pipeline_mode = #tpu.pipeline_mode<synchronous>, transform_indices = @transform_9, window_bounds = array<i64: 30, 50>}, {pipeline_mode = #tpu.pipeline_mode<synchronous>, transform_indices = @transform_10, window_bounds = array<i64: 30, 1>}, {pipeline_mode = #tpu.pipeline_mode<synchronous>, transform_indices = @transform_11, window_bounds = array<i64: 17, 30>}, {pipeline_mode = #tpu.pipeline_mode<synchronous>, transform_indices = @transform_12, window_bounds = array<i64: 17, 1>}, {transform_indices = @transform_13, window_bounds = array<i64: 17, 128>}]} {
    %c0 = arith.constant 0 : index
    %c0_0 = arith.constant 0 : index
    %0 = vector.load %arg2[%c0, %c0_0] : memref<35x61xbf16, #tpu.memory_space<vmem>>, vector<35x61xbf16>
    %c0_1 = arith.constant 0 : index
    %c0_2 = arith.constant 0 : index
    %1 = vector.load %arg3[%c0_1, %c0_2] : memref<35x1xf32, #tpu.memory_space<vmem>>, vector<35x1xf32>
    %c0_3 = arith.constant 0 : index
    %c0_4 = arith.constant 0 : index
    %2 = vector.load %arg1[%c0_3, %c0_4] : memref<128x61xbf16, #tpu.memory_space<vmem>>, vector<128x61xbf16>
    %cst = arith.constant dense<0.000000e+00> : vector<35x128xf32>
    %3 = tpu.matmul %0, %2, %cst {dimension_numbers = #tpu.dot_dimension_numbers<[1], [1], [0], [0], [0, 0, 1, 0], [], []>} : vector<35x61xbf16>, vector<128x61xbf16>, vector<35x128xf32> -> vector<35x128xf32>
    %4 = vector.broadcast %1 : vector<35x1xf32> to vector<35x128xf32>
    %5 = arith.addf %3, %4 : vector<35x128xf32>
    %cst_5 = arith.constant 0.000000e+00 : f32
    %6 = vector.broadcast %cst_5 : f32 to vector<35x128xf32>
    %7 = arith.maximumf %5, %6 : vector<35x128xf32>
    %c0_6 = arith.constant 0 : index
    %c0_7 = arith.constant 0 : index
    %8 = vector.load %arg4[%c0_6, %c0_7] : memref<50x35xbf16, #tpu.memory_space<vmem>>, vector<50x35xbf16>
    %c0_8 = arith.constant 0 : index
    %c0_9 = arith.constant 0 : index
    %9 = vector.load %arg5[%c0_8, %c0_9] : memref<50x1xf32, #tpu.memory_space<vmem>>, vector<50x1xf32>
    %10 = arith.truncf %7 : vector<35x128xf32> to vector<35x128xbf16>
    %cst_10 = arith.constant dense<0.000000e+00> : vector<50x128xf32>
    %11 = tpu.matmul %8, %10, %cst_10 {dimension_numbers = #tpu.dot_dimension_numbers<[1], [0], [0], [1], [0, 0, 1, 1], [], []>} : vector<50x35xbf16>, vector<35x128xbf16>, vector<50x128xf32> -> vector<50x128xf32>
    %12 = vector.broadcast %9 : vector<50x1xf32> to vector<50x128xf32>
    %13 = arith.addf %11, %12 : vector<50x128xf32>
    %cst_11 = arith.constant 0.000000e+00 : f32
    %14 = vector.broadcast %cst_11 : f32 to vector<50x128xf32>
    %15 = arith.maximumf %13, %14 : vector<50x128xf32>
    %c0_12 = arith.constant 0 : index
    %c0_13 = arith.constant 0 : index
    %16 = vector.load %arg6[%c0_12, %c0_13] : memref<35x50xbf16, #tpu.memory_space<vmem>>, vector<35x50xbf16>
    %c0_14 = arith.constant 0 : index
    %c0_15 = arith.constant 0 : index
    %17 = vector.load %arg7[%c0_14, %c0_15] : memref<35x1xf32, #tpu.memory_space<vmem>>, vector<35x1xf32>
    %18 = arith.truncf %15 : vector<50x128xf32> to vector<50x128xbf16>
    %cst_16 = arith.constant dense<0.000000e+00> : vector<35x128xf32>
    %19 = tpu.matmul %16, %18, %cst_16 {dimension_numbers = #tpu.dot_dimension_numbers<[1], [0], [0], [1], [0, 0, 1, 1], [], []>} : vector<35x50xbf16>, vector<50x128xbf16>, vector<35x128xf32> -> vector<35x128xf32>
    %20 = vector.broadcast %17 : vector<35x1xf32> to vector<35x128xf32>
    %21 = arith.addf %19, %20 : vector<35x128xf32>
    %cst_17 = arith.constant 0.000000e+00 : f32
    %22 = vector.broadcast %cst_17 : f32 to vector<35x128xf32>
    %23 = arith.maximumf %21, %22 : vector<35x128xf32>
    %c0_18 = arith.constant 0 : index
    %c0_19 = arith.constant 0 : index
    %24 = vector.load %arg8[%c0_18, %c0_19] : memref<50x35xbf16, #tpu.memory_space<vmem>>, vector<50x35xbf16>
    %c0_20 = arith.constant 0 : index
    %c0_21 = arith.constant 0 : index
    %25 = vector.load %arg9[%c0_20, %c0_21] : memref<50x1xf32, #tpu.memory_space<vmem>>, vector<50x1xf32>
    %26 = arith.truncf %23 : vector<35x128xf32> to vector<35x128xbf16>
    %cst_22 = arith.constant dense<0.000000e+00> : vector<50x128xf32>
    %27 = tpu.matmul %24, %26, %cst_22 {dimension_numbers = #tpu.dot_dimension_numbers<[1], [0], [0], [1], [0, 0, 1, 1], [], []>} : vector<50x35xbf16>, vector<35x128xbf16>, vector<50x128xf32> -> vector<50x128xf32>
    %28 = vector.broadcast %25 : vector<50x1xf32> to vector<50x128xf32>
    %29 = arith.addf %27, %28 : vector<50x128xf32>
    %cst_23 = arith.constant 0.000000e+00 : f32
    %30 = vector.broadcast %cst_23 : f32 to vector<50x128xf32>
    %31 = arith.maximumf %29, %30 : vector<50x128xf32>
    %c0_24 = arith.constant 0 : index
    %c0_25 = arith.constant 0 : index
    %32 = vector.load %arg10[%c0_24, %c0_25] : memref<30x50xbf16, #tpu.memory_space<vmem>>, vector<30x50xbf16>
    %c0_26 = arith.constant 0 : index
    %c0_27 = arith.constant 0 : index
    %33 = vector.load %arg11[%c0_26, %c0_27] : memref<30x1xf32, #tpu.memory_space<vmem>>, vector<30x1xf32>
    %34 = arith.truncf %31 : vector<50x128xf32> to vector<50x128xbf16>
    %cst_28 = arith.constant dense<0.000000e+00> : vector<30x128xf32>
    %35 = tpu.matmul %32, %34, %cst_28 {dimension_numbers = #tpu.dot_dimension_numbers<[1], [0], [0], [1], [0, 0, 1, 1], [], []>} : vector<30x50xbf16>, vector<50x128xbf16>, vector<30x128xf32> -> vector<30x128xf32>
    %36 = vector.broadcast %33 : vector<30x1xf32> to vector<30x128xf32>
    %37 = arith.addf %35, %36 : vector<30x128xf32>
    %cst_29 = arith.constant 0.000000e+00 : f32
    %38 = vector.broadcast %cst_29 : f32 to vector<30x128xf32>
    %39 = arith.maximumf %37, %38 : vector<30x128xf32>
    %c0_30 = arith.constant 0 : index
    %c0_31 = arith.constant 0 : index
    %40 = vector.load %arg12[%c0_30, %c0_31] : memref<17x30xbf16, #tpu.memory_space<vmem>>, vector<17x30xbf16>
    %c0_32 = arith.constant 0 : index
    %c0_33 = arith.constant 0 : index
    %41 = vector.load %arg13[%c0_32, %c0_33] : memref<17x1xf32, #tpu.memory_space<vmem>>, vector<17x1xf32>
    %42 = arith.truncf %39 : vector<30x128xf32> to vector<30x128xbf16>
    %cst_34 = arith.constant dense<0.000000e+00> : vector<17x128xf32>
    %43 = tpu.matmul %40, %42, %cst_34 {dimension_numbers = #tpu.dot_dimension_numbers<[1], [0], [0], [1], [0, 0, 1, 1], [], []>} : vector<17x30xbf16>, vector<30x128xbf16>, vector<17x128xf32> -> vector<17x128xf32>
    %44 = vector.broadcast %41 : vector<17x1xf32> to vector<17x128xf32>
    %45 = arith.addf %43, %44 : vector<17x128xf32>
    %c0_35 = arith.constant 0 : index
    %c0_36 = arith.constant 0 : index
    %46 = vector.load %arg14[%c0_35, %c0_36] : memref<17x128xf32, #tpu.memory_space<vmem>>, vector<17x128xf32>
    tpu.vector_store %arg14[%c0_35, %c0_36], %45 {strides = array<i32>} : memref<17x128xf32, #tpu.memory_space<vmem>>, vector<17x128xf32>,
    return
  }
  func.func @transform_0(%arg0: i32) -> (i32, i32) {
    %c0_i32 = arith.constant 0 : i32
    %c0_i32_0 = arith.constant 0 : i32
    return %arg0, %c0_i32 : i32, i32
  }
  func.func @transform_1(%arg0: i32) -> (i32, i32) {
    %c0_i32 = arith.constant 0 : i32
    %c0_i32_0 = arith.constant 0 : i32
    %c0_i32_1 = arith.constant 0 : i32
    return %c0_i32, %c0_i32_0 : i32, i32
  }
  func.func @transform_2(%arg0: i32) -> (i32, i32) {
    %c0_i32 = arith.constant 0 : i32
    %c0_i32_0 = arith.constant 0 : i32
    %c0_i32_1 = arith.constant 0 : i32
    return %c0_i32, %c0_i32_0 : i32, i32
  }
  func.func @transform_3(%arg0: i32) -> (i32, i32) {
    %c0_i32 = arith.constant 0 : i32
    %c0_i32_0 = arith.constant 0 : i32
    %c0_i32_1 = arith.constant 0 : i32
    return %c0_i32, %c0_i32_0 : i32, i32
  }
  func.func @transform_4(%arg0: i32) -> (i32, i32) {
    %c0_i32 = arith.constant 0 : i32
    %c0_i32_0 = arith.constant 0 : i32
    %c0_i32_1 = arith.constant 0 : i32
    return %c0_i32, %c0_i32_0 : i32, i32
  }
  func.func @transform_5(%arg0: i32) -> (i32, i32) {
    %c0_i32 = arith.constant 0 : i32
    %c0_i32_0 = arith.constant 0 : i32
    %c0_i32_1 = arith.constant 0 : i32
    return %c0_i32, %c0_i32_0 : i32, i32
  }
  func.func @transform_6(%arg0: i32) -> (i32, i32) {
    %c0_i32 = arith.constant 0 : i32
    %c0_i32_0 = arith.constant 0 : i32
    %c0_i32_1 = arith.constant 0 : i32
    return %c0_i32, %c0_i32_0 : i32, i32
  }
  func.func @transform_7(%arg0: i32) -> (i32, i32) {
    %c0_i32 = arith.constant 0 : i32
    %c0_i32_0 = arith.constant 0 : i32
    %c0_i32_1 = arith.constant 0 : i32
    return %c0_i32, %c0_i32_0 : i32, i32
  }
  func.func @transform_8(%arg0: i32) -> (i32, i32) {
    %c0_i32 = arith.constant 0 : i32
    %c0_i32_0 = arith.constant 0 : i32
    %c0_i32_1 = arith.constant 0 : i32
    return %c0_i32, %c0_i32_0 : i32, i32
  }
  func.func @transform_9(%arg0: i32) -> (i32, i32) {
    %c0_i32 = arith.constant 0 : i32
    %c0_i32_0 = arith.constant 0 : i32
    %c0_i32_1 = arith.constant 0 : i32
    return %c0_i32, %c0_i32_0 : i32, i32
  }
  func.func @transform_10(%arg0: i32) -> (i32, i32) {
    %c0_i32 = arith.constant 0 : i32
    %c0_i32_0 = arith.constant 0 : i32
    %c0_i32_1 = arith.constant 0 : i32
    return %c0_i32, %c0_i32_0 : i32, i32
  }
  func.func @transform_11(%arg0: i32) -> (i32, i32) {
    %c0_i32 = arith.constant 0 : i32
    %c0_i32_0 = arith.constant 0 : i32
    %c0_i32_1 = arith.constant 0 : i32
    return %c0_i32, %c0_i32_0 : i32, i32
  }
  func.func @transform_12(%arg0: i32) -> (i32, i32) {
    %c0_i32 = arith.constant 0 : i32
    %c0_i32_0 = arith.constant 0 : i32
    %c0_i32_1 = arith.constant 0 : i32
    return %c0_i32, %c0_i32_0 : i32, i32
  }
  func.func @transform_13(%arg0: i32) -> (i32, i32) {
    %c0_i32 = arith.constant 0 : i32
    %c0_i32_0 = arith.constant 0 : i32
    return %c0_i32, %arg0 : i32, i32
  }
}

</mosaic_0001>

<bundles_post_ra>
// kernel: tpu_custom_call.1
= control target key start
LH: loop header
LB: loop body
LE: loop exit
PB: predicated region body
PF: predicated region fallthrough
CT: control target
= control target key end

     0   :  { %v1144_v1 = vmov 0.0   ;;  %vm150_vm0 = vcmask 498688   ;;  %vm1145_vm1 = vmmov 0   ;;  %v1146_v8 = vmov 0   ;;  %s1462_s0 = inlined_call_operand.vmem [shape: bf16[128,61], index: 0, kind: input, shape index: {}]   ;;  %s1463_s1 = inlined_call_operand.vmem [shape: bf16[35,61], index: 1, kind: input, shape index: {}]   ;;  %s1464_s2 = inlined_call_operand.vmem [shape: f32[35,1], index: 2, kind: input, shape index: {}]   ;;  %s1465_s3 = inlined_call_operand.vmem [shape: bf16[50,35], index: 3, kind: input, shape index: {}]   ;;  %s1466_s4 = inlined_call_operand.vmem [shape: f32[50,1], index: 4, kind: input, shape index: {}]   ;;  %s1467_s5 = inlined_call_operand.vmem [shape: bf16[35,50], index: 5, kind: input, shape index: {}]   ;;  %s1468_s6 = inlined_call_operand.vmem [shape: f32[35,1], index: 6, kind: input, shape index: {}]   ;;  %s1469_s7 = inlined_call_operand.vmem [shape: bf16[50,35], index: 7, kind: input, shape index: {}]   ;;  %s1470_s8 = inlined_call_operand.vmem [shape: f32[50,1], index: 8, kind: input, shape index: {}]   ;;  %s1471_s9 = inlined_call_operand.vmem [shape: bf16[30,50], index: 9, kind: input, shape index: {}]   ;;  %s1472_s10 = inlined_call_operand.vmem [shape: f32[30,1], index: 10, kind: input, shape index: {}]   ;;  %s1473_s11 = inlined_call_operand.vmem [shape: bf16[17,30], index: 11, kind: input, shape index: {}]   ;;  %s1474_s12 = inlined_call_operand.vmem [shape: f32[17,1], index: 12, kind: input, shape index: {}]   ;;  %s1475_s13 = inlined_call_operand.hbm [shape: f32[17,128], index: 13, kind: output, shape index: {}]  }
   0x1   :  { %v1094_v0 = vld [vmem:[%s1462_s0] sm:$0xff]   ;;  %987 = vmatprep.subr.bf16.mxu0 %v1144_v1  ;;  %v1095_v3 = vld [vmem:[%s1462_s0 + $0x8] sm:$0xff]   ;;  %1003 = vmatprep.mubr.msk.bf16.mxu0 %vm1145_vm1, %v1144_v1  ;;  %v53_v6 = vld [vmem:[%s1464_s2 + $0x10] sm:$0xff] }
   0x2   :  { %v161_v2 = vsel %vm150_vm0, %v1094_v0, 0  ;;  %v164_v4 = vsel %vm150_vm0, %v1095_v3, 0  ;;  %v51_v5 = vld [vmem:[%s1464_s2] sm:$0xff]  ;;  %v1096_v7 = vld [vmem:[%s1462_s0 + $0x10] sm:$0xff]   ;;  %1092 = vset.pattern.permute.xlu0 %v1146_v8  ;;  %1093 = vset.pattern.permute.xlu1 %v1146_v8  ;;  %v52_v9 = vld [vmem:[%s1464_s2 + $0x8] sm:$0xff] }
   0x3   :  { %988 = vmatpush3.bf16.xpose.msra.mxu0 %v161_v2  ;;  %74 = vperm.xlu0 %1092, %v51_v5   ;;  %v54_v10 = vld [vmem:[%s1464_s2 + $0x18] sm:$0xff]  ;;  %v167_v11 = vsel %vm150_vm0, %v1096_v7, 0  ;;  %v55_v13 = vld [vmem:[%s1464_s2 + $0x20] sm:$0x7]  ;;  %v253_v15 = vld [vmem:[%s1466_s4 + $0x8] sm:$0xff] }
   0x4   :  { %989 = vmatprep.subr.bf16.mxu0 %v1144_v1  ;;  %84 = vperm.xlu1 %1093, %v53_v6   ;;  %v1097_v12 = vld [vmem:[%s1462_s0 + $0x18] sm:$0xff]   ;;  %v252_v14 = vld [vmem:[%s1466_s4] sm:$0xff]  ;;  %v254_v17 = vld [vmem:[%s1466_s4 + $0x10] sm:$0xff] }
   0x5   :  { %v170_v16 = vsel %vm150_vm0, %v1097_v12, 0  ;;  %v255_v18 = vld [vmem:[%s1466_s4 + $0x18] sm:$0xff]  ;;  %v256_v19 = vld [vmem:[%s1466_s4 + $0x20] sm:$0xff]  ;;  %v257_v21 = vld [vmem:[%s1466_s4 + $0x28] sm:$0xff] }
   0x6   :  { %v1098_v20 = vld [vmem:[%s1462_s0 + $0x20] sm:$0xff]  }
   0x7   :  { %79 = vperm.xlu0 %1092, %v52_v9  }
   0x8   :  { %89 = vperm.xlu1 %1093, %v54_v10  }
   0xb   :  { %990 = vmatpush3.bf16.xpose.msra.mxu0 %v164_v4  ;;  %94 = vperm.xlu0 %1092, %v55_v13  }
   0xc   :  { %991 = vmatprep.subr.bf16.mxu0 %v1144_v1  ;;  %264 = vperm.xlu1 %1093, %v252_v14  }
   0xf   :  { %269 = vperm.xlu0 %1092, %v253_v15  }
  0x10   :  { %274 = vperm.xlu1 %1093, %v254_v17  }
  0x13   :  { %992 = vmatpush3.bf16.xpose.msra.mxu0 %v167_v11  ;;  %279 = vperm.xlu0 %1092, %v255_v18  }
  0x14   :  { %993 = vmatprep.subr.bf16.mxu0 %v1144_v1  ;;  %284 = vperm.xlu1 %1093, %v256_v19  }
  0x1b   :  { %994 = vmatpush3.bf16.xpose.msra.mxu0 %v170_v16 }
  0x1c   :  { %995 = vmatprep.subr.bf16.mxu0 %v1144_v1 }
  0x1d   :  { %18 = vsyncpa [#allocation3], 0  ;;  %v258_v22 = vld [vmem:[%s1466_s4 + $0x30] sm:$0x3]  ;;  %v173_v23 = vsel %vm150_vm0, %v1098_v20, 0  ;;  %289 = vperm.xlu0 %1092, %v257_v21   ;;  %v411_v24 = vld [vmem:[%s1468_s6] sm:$0xff] }
  0x1e   :  { %294 = vperm.xlu1 %1093, %v258_v22   ;;  %v412_v25 = vld [vmem:[%s1468_s6 + $0x8] sm:$0xff]  ;;  %v413_v27 = vld [vmem:[%s1468_s6 + $0x10] sm:$0xff]  ;;  %v414_v28 = vld [vmem:[%s1468_s6 + $0x18] sm:$0xff]  ;;  %vm315_vm2 = vcmask 285696   ;;  %vm328_vm3 = vcmask 1040384   ;;  %vm329_vm4 = vcmask 1041408  }
  0x1f   :  { %v1099_v26 = vld [vmem:[%s1462_s0 + $0x28] sm:$0xff]   ;;  %v415_v30 = vld [vmem:[%s1468_s6 + $0x20] sm:$0x7]  ;;  %v1100_v32 = vld [vmem:[%s1462_s0 + $0x30] sm:$0xff]   ;;  %v1147_v15 = vmov 65535   ;;  %vm458_vm5 = vcmask 408576  }
  0x20   :  { %v176_v29 = vsel %vm150_vm0, %v1099_v26, 0  ;;  %v539_v31 = vld [vmem:[%s1470_s8] sm:$0xff]  ;;  %v540_v33 = vld [vmem:[%s1470_s8 + $0x8] sm:$0xff]  ;;  %v541_v34 = vld [vmem:[%s1470_s8 + $0x10] sm:$0xff]  ;;  %v179_v35 = vsel %vm150_vm0, %v1100_v32, 0  ;;  %v330_v16 = vsel %vm328_vm3, 4294967295, %v1147_v15 }
  0x21   :  { %422 = vperm.xlu0 %1092, %v411_v24   ;;  %v542_v36 = vld [vmem:[%s1470_s8 + $0x18] sm:$0xff]  ;;  %v543_v37 = vld [vmem:[%s1470_s8 + $0x20] sm:$0xff]  ;;  %v544_v39 = vld [vmem:[%s1470_s8 + $0x28] sm:$0xff]  ;;  %v1377_v21 = vsel %vm329_vm4, %v330_v16, 0  ;;  %vm823_vm6 = vcmask 244736   ;;  %vm830_vm7 = vcmask 1046528  }
  0x22   :  { %427 = vperm.xlu1 %1093, %v412_v25   ;;  %v1101_v38 = vld [vmem:[%s1462_s0 + $0x38] sm:$0xff]   ;;  %v545_v40 = vld [vmem:[%s1470_s8 + $0x30] sm:$0x3]  ;;  %v692_v42 = vld [vmem:[%s1472_s10] sm:$0xff]  ;;  %s1148_s14 = smov [#allocation2]  }
  0x23   :  { %996 = vmatpush3.bf16.xpose.msra.mxu0 %v173_v23  ;;  %v182_v41 = vsel %vm150_vm0, %v1101_v38, 0  ;;  %v693_v43 = vld [vmem:[%s1472_s10 + $0x8] sm:$0xff]  ;;  %v1102_v44 = vld [vmem:[%s1463_s1] sm:$0xff]   ;;  %v694_v45 = vld [vmem:[%s1472_s10 + $0x10] sm:$0xff] }
  0x24   :  { %997 = vmatprep.subr.bf16.mxu0 %v1144_v1  ;;  %v695_v46 = vld [vmem:[%s1472_s10 + $0x18] sm:$0x3f]  ;;  %v795_v47 = vld [vmem:[%s1474_s12] sm:$0xff]  ;;  %v796_v48 = vld [vmem:[%s1474_s12 + $0x8] sm:$0xff] }
  0x25   :  { %432 = vperm.xlu0 %1092, %v413_v27   ;;  %v1103_v49 = vld [vmem:[%s1463_s1 + $0x8] sm:$0xff]   ;;  %v797_v50 = vld [vmem:[%s1474_s12 + $0x10] sm:$0x1]  ;;  %v1105_v52 = vld [vmem:[%s1465_s3] sm:$0xff]  }
  0x26   :  { %437 = vperm.xlu1 %1093, %v414_v28   ;;  %v1104_v51 = vld [vmem:[%s1463_s1 + $0x10] ss:$0 sps:$4 sm:$0x33]   ;;  %1021 = vmatprep.mubr.msk.bf16.mxu1 %vm315_vm2, %v1105_v52  ;;  %v1106_v24 = vld [vmem:[%s1465_s3 + $0x8] sm:$0xff]   ;;  %s890_s1 = sshll.u32 %s1148_s14, 4  ;;  %s891_s1 = int_to_ptr.vmem [resolvable:$true] %s890_s1 }
  0x27   :  { %v1107_v25 = vld [vmem:[%s1465_s3 + $0x10] sm:$0xff]   ;;  %v1108_v26 = vld [vmem:[%s1465_s3 + $0x18] ss:$0 sps:$4 sm:$0x11]   ;;  %p1125_p1 = scmp.lt.s32.totalorder %s891_s1, %s891_s1 }
  0x29   :  { %442 = vperm.xlu0 %1092, %v415_v30  }
  0x2a   :  { %551 = vperm.xlu1 %1093, %v539_v31  }
  0x2b   :  { %998 = vmatpush3.bf16.xpose.msra.mxu0 %v176_v29 }
  0x2c   :  { %999 = vmatprep.subr.bf16.mxu0 %v1144_v1 }
  0x2d   :  { %556 = vperm.xlu0 %1092, %v540_v33  }
  0x2e   :  { %561 = vperm.xlu1 %1093, %v541_v34  }
  0x31   :  { %566 = vperm.xlu0 %1092, %v542_v36  }
  0x32   :  { %571 = vperm.xlu1 %1093, %v543_v37  }
  0x33   :  { %1000 = vmatpush3.bf16.xpose.msra.mxu0 %v179_v35 }
  0x34   :  { %1001 = vmatprep.subr.bf16.mxu0 %v1144_v1 }
  0x35   :  { %576 = vperm.xlu0 %1092, %v544_v39  }
  0x36   :  { %581 = vperm.xlu1 %1093, %v545_v40  }
  0x39   :  { %702 = vperm.xlu0 %1092, %v692_v42  }
  0x3a   :  { %707 = vperm.xlu1 %1093, %v693_v43  }
  0x3b   :  { %1002 = vmatpush3.bf16.xpose.msra.mxu0 %v182_v41 }
  0x3d   :  { %712 = vperm.xlu0 %1092, %v694_v45  }
  0x3e   :  { %717 = vperm.xlu1 %1093, %v695_v46  }
  0x41   :  { %802 = vperm.xlu0 %1092, %v795_v47  }
  0x42   :  { %1004 = vmatmul.mubr.msk.bf16.vlgmr.msra.gmra.mrb[0].mxu0 %vm150_vm0, %v1102_v44  ;;  %807 = vperm.xlu1 %1093, %v796_v48  }
  0x43   :  { %1007 = vmatprep.mubr.msk.bf16.mxu0 %vm1145_vm1, %v1144_v1 }
  0x45   :  { %812 = vperm.xlu0 %1092, %v797_v50  }
  0x4a   :  { %1008 = vmatmul.mubr.msk.bf16.gmra.mrb[4].mxu0 %vm150_vm0, %v1103_v49 }
  0x4b   :  { %1011 = vmatprep.mubr.msk.bf16.mxu0 %vm1145_vm1, %v1144_v1 }
  0x52   :  { %1012 = vmatmul.mubr.msk.bf16.gmra.mrb[8].mxu0 %vm150_vm0, %v1104_v51 }
  0x82   :  { %v75_v53 = vpop.permute.xlu0 %74 }
  0x83   :  { %v85_v61 = vpop.permute.xlu1 %84 }
  0x86   :  { %v80_v57 = vpop.permute.xlu0 %79 }
  0x87   :  { %v90_v5 = vpop.permute.xlu1 %89 }
  0x8a   :  { %v95_v12 = vpop.permute.xlu0 %94 }
  0x8b   :  { %v265_v27 = vpop.permute.xlu1 %264 }
  0x8e   :  { %v270_v28 = vpop.permute.xlu0 %269 }
  0x8f   :  { %v275_v29 = vpop.permute.xlu1 %274 }
  0x92   :  { %v280_v31 = vpop.permute.xlu0 %279 }
  0x93   :  { %v285_v34 = vpop.permute.xlu1 %284 }
  0x9c   :  { %v290_v52 = vpop.permute.xlu0 %289 }
  0x9d   :  { %v295_v45 = vpop.permute.xlu1 %294 }
 0x115   :  { %v218_v54 = vpop.f32.mrb[0].mxu0 }
 0x116   :  { %v219_v55 = vadd.f32 %v218_v54, %v75_v53  ;;  %v1005_v56 = vpop.f32.mrb[1].mxu0 }
 0x117   :  { %v221_v58 = vpop.f32.mrb[2].mxu0 }
 0x118   :  { %v222_v59 = vadd.f32 %v221_v58, %v80_v57  ;;  %v1006_v60 = vpop.f32.mrb[3].mxu0  ;;  %v240_v62 = vmax.f32 %v219_v55, 0.0 }
 0x11a   :  { %v241_v63 = vmax.f32 %v222_v59, 0.0 }
 0x11c   :  { %v259_v0 = vpack.c.bf16 %v241_v63, %v240_v62  ;;  %v1110_v62 = vld [vmem:[%s1467_s5 + $0x8] sm:$0xff]   ;;  %v1111_v63 = vld [vmem:[%s1467_s5 + $0x10] ss:$0 sps:$4 sm:$0x33]  }
 0x11d   :  { %v226_v2 = vpop.f32.mrb[4].mxu0 }
 0x11e   :  { %v227_v3 = vadd.f32 %v226_v2, %v85_v61  ;;  %v1009_v4 = vpop.f32.mrb[5].mxu0  ;;  %1015 = vmatprep.subr.bf16.mxu1 %v259_v0  ;;  %v1109_v61 = vld [vmem:[%s1467_s5] sm:$0xff]   ;;  %v423_v2 = vpop.permute.xlu0 %422 }
 0x11f   :  { %v229_v6 = vpop.f32.mrb[6].mxu0  ;;  %1016 = vmatpush3.bf16.msra.mxu1 %v259_v0  ;;  %v1112_v0 = vld [vmem:[%s1469_s7] sm:$0xff]  }
 0x120   :  { %v230_v7 = vadd.f32 %v229_v6, %v90_v5  ;;  %v1010_v8 = vpop.f32.mrb[7].mxu0  ;;  %v242_v9 = vmax.f32 %v227_v3, 0.0  ;;  %v428_v6 = vpop.permute.xlu1 %427 }
 0x122   :  { %v243_v10 = vmax.f32 %v230_v7, 0.0 }
 0x124   :  { %v260_v11 = vpack.c.bf16 %v243_v10, %v242_v9  ;;  %v438_v16 = vpop.permute.xlu1 %437 }
 0x125   :  { %v234_v13 = vpop.f32.mrb[8].mxu0 }
 0x126   :  { %v235_v14 = vadd.f32 %v234_v13, %v95_v12  ;;  %v1013_v17 = vpop.f32.mrb[9].mxu0  ;;  %1017 = vmatprep.subr.bf16.mxu1 %v260_v11  ;;  %v433_v12 = vpop.permute.xlu0 %432 }
 0x127   :  { %v237_v18 = vpop.f32.mrb[10].mxu0  ;;  %1018 = vmatpush3.bf16.msra.mxu1 %v260_v11 }
 0x128   :  { %v244_v19 = vmax.f32 %v235_v14, 0.0  ;;  %v1014_v20 = vpop.f32.mrb[11].mxu0 }
 0x12a   :  { %v261_v22 = vpack.c.bf16 %v244_v19, %v244_v19 }
 0x12c   :  { %v333_v23 = vand.u32 %v1377_v21, %v261_v22 }
 0x12e   :  { %1019 = vmatprep.subr.bf16.mxu1 %v333_v23 }
 0x12f   :  { %1020 = vmatpush3.bf16.msra.mxu1 %v333_v23 }
 0x130   :  { %1029 = vmatprep.subr.bf16.mxu1 %v1144_v1 }
 0x132   :  { %1022 = vmatmul.mubr.msk.bf16.vlgmr.msra.gmra.mrb[0].mxu1 %vm315_vm2, %v1106_v24  ;;  %v443_v24 = vpop.permute.xlu0 %442 }
 0x133   :  { %1025 = vmatprep.mubr.msk.bf16.mxu1 %vm315_vm2, %v1107_v25 }
 0x13a   :  { %1026 = vmatmul.mubr.msk.bf16.gmra.mrb[4].mxu1 %vm315_vm2, %v1108_v26 }
 0x13b   :  { %1037 = vmatprep.mubr.msk.bf16.mxu1 %vm1145_vm1, %v1144_v1 }
 0x205   :  { %v1023_v30 = vpop.f32.mrb[0].mxu1 }
 0x206   :  { %v378_v32 = vadd.f32 %v1023_v30, %v275_v29  ;;  %v369_v33 = vpop.f32.mrb[1].mxu1 }
 0x207   :  { %v370_v35 = vadd.f32 %v369_v33, %v265_v27  ;;  %v1024_v36 = vpop.f32.mrb[2].mxu1  ;;  %v1113_v33 = vld [vmem:[%s1469_s7 + $0x8] sm:$0xff]  }
 0x208   :  { %v381_v37 = vadd.f32 %v1024_v36, %v280_v31  ;;  %v372_v38 = vpop.f32.mrb[3].mxu1  ;;  %v401_v40 = vmax.f32 %v378_v32, 0.0  ;;  %v552_v36 = vpop.permute.xlu1 %551 }
 0x209   :  { %v373_v39 = vadd.f32 %v372_v38, %v270_v28  ;;  %v399_v42 = vmax.f32 %v370_v35, 0.0  ;;  %v1115_v35 = vld [vmem:[%s1469_s7 + $0x18] ss:$0 sps:$4 sm:$0x11]  }
 0x20a   :  { %v402_v41 = vmax.f32 %v381_v37, 0.0  ;;  %v557_v37 = vpop.permute.xlu0 %556 }
 0x20b   :  { %v400_v43 = vmax.f32 %v373_v39, 0.0 }
 0x20c   :  { %v417_v44 = vpack.c.bf16 %v402_v41, %v401_v40  ;;  %v562_v38 = vpop.permute.xlu1 %561 }
 0x20d   :  { %v416_v46 = vpack.c.bf16 %v400_v43, %v399_v42  ;;  %v1027_v47 = vpop.f32.mrb[4].mxu1 }
 0x20e   :  { %v394_v48 = vadd.f32 %v1027_v47, %v295_v45  ;;  %v385_v49 = vpop.f32.mrb[5].mxu1  ;;  %v567_v42 = vpop.permute.xlu0 %566 }
 0x20f   :  { %v386_v50 = vadd.f32 %v385_v49, %v285_v34  ;;  %v1028_v51 = vpop.f32.mrb[6].mxu1  ;;  %1030 = vmatpush3.bf16.msra.mxu1 %v416_v46  ;;  %v1114_v34 = vld [vmem:[%s1469_s7 + $0x10] sm:$0xff]  }
 0x210   :  { %v388_v53 = vpop.f32.mrb[7].mxu1  ;;  %1031 = vmatprep.subr.bf16.mxu1 %v1144_v1  ;;  %v405_v55 = vmax.f32 %v394_v48, 0.0  ;;  %v572_v45 = vpop.permute.xlu1 %571 }
 0x211   :  { %v389_v54 = vadd.f32 %v388_v53, %v290_v52  ;;  %v403_v56 = vmax.f32 %v386_v50, 0.0 }
 0x212   :  { %v419_v59 = vpack.c.bf16 %v405_v55, %v405_v55 }
 0x213   :  { %v404_v57 = vmax.f32 %v389_v54, 0.0  ;;  %1032 = vmatpush3.bf16.msra.mxu1 %v417_v44 }
 0x214   :  { %1033 = vmatprep.subr.bf16.mxu1 %v1144_v1  ;;  %v469_v60 = vsel %vm328_vm3, %v419_v59, 0 }
 0x215   :  { %v418_v58 = vpack.c.bf16 %v404_v57, %v403_v56  ;;  %v582_v56 = vpop.permute.xlu1 %581 }
 0x217   :  { %1034 = vmatpush3.bf16.msra.mxu1 %v418_v58 }
 0x218   :  { %1035 = vmatprep.subr.bf16.mxu1 %v1144_v1 }
 0x21b   :  { %1036 = vmatpush3.bf16.msra.mxu1 %v469_v60 }
 0x21e   :  { %1038 = vmatmul.mubr.msk.bf16.vlgmr.msra.gmra.mrb[8].mxu1 %vm458_vm5, %v1109_v61  ;;  %v577_v61 = vpop.permute.xlu0 %576 }
 0x21f   :  { %1041 = vmatprep.mubr.msk.bf16.mxu1 %vm1145_vm1, %v1144_v1 }
 0x226   :  { %1042 = vmatmul.mubr.msk.bf16.gmra.mrb[12].mxu1 %vm458_vm5, %v1110_v62 }
 0x227   :  { %1045 = vmatprep.mubr.msk.bf16.mxu1 %vm1145_vm1, %v1144_v1 }
 0x22e   :  { %1046 = vmatmul.mubr.msk.bf16.gmra.mrb[16].mxu1 %vm458_vm5, %v1111_v63 }
 0x22f   :  { %1055 = vmatprep.mubr.msk.bf16.mxu1 %vm315_vm2, %v1112_v0 }
 0x2f1   :  { %v505_v3 = vpop.f32.mrb[8].mxu1 }
 0x2f2   :  { %v506_v4 = vadd.f32 %v505_v3, %v423_v2  ;;  %v1039_v5 = vpop.f32.mrb[9].mxu1 }
 0x2f3   :  { %v508_v7 = vpop.f32.mrb[10].mxu1 }
 0x2f4   :  { %v509_v8 = vadd.f32 %v508_v7, %v428_v6  ;;  %v1040_v1 = vpop.f32.mrb[11].mxu1  ;;  %v527_v9 = vmax.f32 %v506_v4, 0.0  ;;  %v1117_v7 = vld [vmem:[%s1471_s9 + $0x8] sm:$0x7f]  }
 0x2f5   :  { %v703_v1 = vpop.permute.xlu0 %702 }
 0x2f6   :  { %v528_v10 = vmax.f32 %v509_v8, 0.0  ;;  %v1118_v8 = vld [vmem:[%s1473_s11] sm:$0xff]  }
 0x2f8   :  { %v546_v11 = vpack.c.bf16 %v528_v10, %v527_v9  ;;  %v708_v9 = vpop.permute.xlu1 %707 }
 0x2f9   :  { %v513_v13 = vpop.f32.mrb[12].mxu1  ;;  %v713_v10 = vpop.permute.xlu0 %712 }
 0x2fa   :  { %v514_v14 = vadd.f32 %v513_v13, %v433_v12  ;;  %v1043_v15 = vpop.f32.mrb[13].mxu1  ;;  %1049 = vmatprep.subr.bf16.mxu1 %v546_v11 }
 0x2fb   :  { %v516_v17 = vpop.f32.mrb[14].mxu1  ;;  %1050 = vmatpush3.bf16.msra.mxu1 %v546_v11 }
 0x2fc   :  { %v517_v18 = vadd.f32 %v516_v17, %v438_v16  ;;  %v1044_v19 = vpop.f32.mrb[15].mxu1  ;;  %v529_v20 = vmax.f32 %v514_v14, 0.0  ;;  %v718_v14 = vpop.permute.xlu1 %717 }
 0x2fe   :  { %v530_v22 = vmax.f32 %v517_v18, 0.0 }
 0x300   :  { %v547_v23 = vpack.c.bf16 %v530_v22, %v529_v20 }
 0x301   :  { %v521_v25 = vpop.f32.mrb[16].mxu1 }
 0x302   :  { %v522_v26 = vadd.f32 %v521_v25, %v443_v24  ;;  %v1047_v27 = vpop.f32.mrb[17].mxu1  ;;  %1051 = vmatprep.subr.bf16.mxu1 %v547_v23 }
 0x303   :  { %v524_v28 = vpop.f32.mrb[18].mxu1  ;;  %1052 = vmatpush3.bf16.msra.mxu1 %v547_v23 }
 0x304   :  { %v531_v29 = vmax.f32 %v522_v26, 0.0  ;;  %v1048_v30 = vpop.f32.mrb[19].mxu1  ;;  %v1119_v28 = vld [vmem:[%s1473_s11 + $0x8] ss:$0 sps:$4 sm:$0x11]   ;;  %s1120_s11 = scalar_lea.vmem %s891_s1, 384 }
 0x305   :  { %p1121_p0 = scmp.ne.s32.totalorder %s891_s1, %s1120_s11  ;;  %p1126_p2 = scmp.lt.s32.totalorder %s1120_s11, %s1120_s11 }
 0x306   :  { %v548_v31 = vpack.c.bf16 %v531_v29, %v531_v29  ;;  %v803_v29 = vpop.permute.xlu0 %802 }
 0x307   :  { %p1127_p3 = por %p1126_p2, %p1125_p1 }
 0x308   :  { %v615_v32 = vand.u32 %v548_v31, %v1377_v21  ;;  %v1116_v21 = vld [vmem:[%s1471_s9] sm:$0xff]  }
 0x309   :  { %p1128_p4 = pnand %p1127_p3, %p1121_p0 }
 0x30a   :  { %1053 = vmatprep.subr.bf16.mxu1 %v615_v32  ;;  %v813_v30 = vpop.permute.xlu0 %812 }
 0x30b   :  { %1054 = vmatpush3.bf16.msra.mxu1 %v615_v32 }
 0x30e   :  { %1056 = vmatmul.mubr.msk.bf16.vlgmr.msra.gmra.mrb[20].mxu1 %vm315_vm2, %v1113_v33 }
 0x30f   :  { %1059 = vmatprep.mubr.msk.bf16.mxu1 %vm315_vm2, %v1114_v34 }
 0x316   :  { %1060 = vmatmul.mubr.msk.bf16.gmra.mrb[24].mxu1 %vm315_vm2, %v1115_v35 }
 0x317   :  { %1071 = vmatprep.mubr.msk.bf16.mxu1 %vm458_vm5, %v1116_v21  ;;  %v808_v21 = vpop.permute.xlu1 %807 }
 0x3e1   :  { %v1057_v39 = vpop.f32.mrb[20].mxu1 }
 0x3e2   :  { %v660_v40 = vadd.f32 %v1057_v39, %v562_v38  ;;  %v651_v41 = vpop.f32.mrb[21].mxu1 }
 0x3e3   :  { %v652_v43 = vadd.f32 %v651_v41, %v552_v36  ;;  %v1058_v44 = vpop.f32.mrb[22].mxu1 }
 0x3e4   :  { %v663_v46 = vadd.f32 %v1058_v44, %v567_v42  ;;  %v654_v47 = vpop.f32.mrb[23].mxu1  ;;  %v683_v49 = vmax.f32 %v660_v40, 0.0 }
 0x3e5   :  { %v655_v48 = vadd.f32 %v654_v47, %v557_v37  ;;  %v681_v51 = vmax.f32 %v652_v43, 0.0 }
 0x3e6   :  { %v684_v50 = vmax.f32 %v663_v46, 0.0 }
 0x3e7   :  { %v682_v52 = vmax.f32 %v655_v48, 0.0 }
 0x3e8   :  { %v697_v53 = vpack.c.bf16 %v684_v50, %v683_v49 }
 0x3e9   :  { %v696_v54 = vpack.c.bf16 %v682_v52, %v681_v51  ;;  %v1061_v55 = vpop.f32.mrb[24].mxu1 }
 0x3ea   :  { %v667_v57 = vpop.f32.mrb[25].mxu1  ;;  %v676_v58 = vadd.f32 %v1061_v55, %v582_v56 }
 0x3eb   :  { %v668_v59 = vadd.f32 %v667_v57, %v572_v45  ;;  %v1062_v60 = vpop.f32.mrb[26].mxu1  ;;  %1063 = vmatprep.subr.bf16.mxu1 %v696_v54 }
 0x3ec   :  { %v670_v62 = vpop.f32.mrb[27].mxu1  ;;  %1064 = vmatpush3.bf16.msra.mxu1 %v696_v54  ;;  %v687_v0 = vmax.f32 %v676_v58, 0.0 }
 0x3ed   :  { %v671_v63 = vadd.f32 %v670_v62, %v577_v61  ;;  %1065 = vmatprep.subr.bf16.mxu1 %v697_v53  ;;  %v685_v2 = vmax.f32 %v668_v59, 0.0 }
 0x3ee   :  { %v699_v5 = vpack.c.bf16 %v687_v0, %v687_v0 }
 0x3ef   :  { %v686_v3 = vmax.f32 %v671_v63, 0.0 }
 0x3f0   :  { %1066 = vmatpush3.bf16.msra.mxu1 %v697_v53  ;;  %v737_v6 = vsel %vm328_vm3, %v699_v5, 0 }
 0x3f1   :  { %v698_v4 = vpack.c.bf16 %v686_v3, %v685_v2 }
 0x3f3   :  { %1067 = vmatprep.subr.bf16.mxu1 %v698_v4 }
 0x3f4   :  { %1068 = vmatpush3.bf16.msra.mxu1 %v698_v4 }
 0x3f5   :  { %1083 = vmatprep.subr.msk.bf16.mxu1 %vm328_vm3, %v699_v5 }
 0x3f8   :  { %1070 = vmatpush3.bf16.msra.mxu1 %v737_v6 }
 0x3fb   :  { %1072 = vmatmul.mubr.msk.bf16.vlgmr.msra.gmra.mrb[28].mxu1 %vm458_vm5, %v1117_v7 }
 0x3fc   :  { %1079 = vmatprep.mubr.msk.bf16.mxu1 %vm823_vm6, %v1118_v8 }
 0x4ce   :  { %v1073_v11 = vpop.f32.mrb[28].mxu1 }
 0x4cf   :  { %v782_v12 = vadd.f32 %v1073_v11, %v713_v10  ;;  %v773_v13 = vpop.f32.mrb[29].mxu1 }
 0x4d0   :  { %v774_v15 = vadd.f32 %v773_v13, %v703_v1  ;;  %v1074_v16 = vpop.f32.mrb[30].mxu1 }
 0x4d1   :  { %v785_v17 = vadd.f32 %v1074_v16, %v718_v14  ;;  %v776_v18 = vpop.f32.mrb[31].mxu1  ;;  %v790_v20 = vmax.f32 %v782_v12, 0.0 }
 0x4d2   :  { %v777_v19 = vadd.f32 %v776_v18, %v708_v9  ;;  %v788_v23 = vmax.f32 %v774_v15, 0.0 }
 0x4d3   :  { %v791_v22 = vmax.f32 %v785_v17, 0.0 }
 0x4d4   :  { %v789_v24 = vmax.f32 %v777_v19, 0.0 }
 0x4d5   :  { %v799_v25 = vpack.c.bf16 %v791_v22, %v790_v20 }
 0x4d6   :  { %v798_v26 = vpack.c.bf16 %v789_v24, %v788_v23 }
 0x4d7   :  { %v832_v27 = vsel %vm830_vm7, %v799_v25, 0 }
 0x4d8   :  { %1075 = vmatprep.subr.bf16.mxu1 %v798_v26 }
 0x4d9   :  { %1076 = vmatpush3.bf16.msra.mxu1 %v798_v26 }
 0x4da   :  { %1084 = vmatprep.subr.msk.bf16.mxu1 %vm830_vm7, %v799_v25 }
 0x4dd   :  { %1078 = vmatpush3.bf16.msra.mxu1 %v832_v27 }
 0x4e0   :  { %1080 = vmatmul.mubr.msk.bf16.vlgmr.msra.gmra.mrb[32].mxu1 %vm823_vm6, %v1119_v28 }
 0x5b3   :  { %v1081_v31 = vpop.f32.mrb[32].mxu1 }
 0x5b4   :  { %v877_v32 = vadd.f32 %v1081_v31, %v813_v30  ;;  %v868_v33 = vpop.f32.mrb[33].mxu1 }
 0x5b5   :  { %v869_v34 = vadd.f32 %v868_v33, %v803_v29  ;;  %v1082_v35 = vpop.f32.mrb[34].mxu1 }
 0x5b6   :  { %884 = vst [vmem:[#allocation2 + $0x10] sm:$0x1] %v877_v32  ;;  %v871_v36 = vpop.f32.mrb[35].mxu1 }
 0x5b7   :  { %882 = vst [vmem:[#allocation2] sm:$0xff] %v869_v34  ;;  %v872_v37 = vadd.f32 %v871_v36, %v808_v21 }
 0x5b9   :  { %883 = vst [vmem:[#allocation2 + $0x8] sm:$0xff] %v872_v37 }
 0x5ba   :  { %1131 = shalt.err (!%p1128_p4)
}
 0x5bb   :  { %s1132_s15 = scalar_lea.hbm %s1475_s13, 384 }
 0x5bc   :  { %p1133_p5 = scmp.ne.s32.totalorder %s1475_s13, %s1132_s15  ;;  %p1136_p6 = scmp.lt.u32.totalorder %s1132_s15, %s1475_s13 }
 0x5be   :  { %p1138_p7 = pnand %p1136_p6, %p1133_p5 }
 0x5c0   :  { %1141 = shalt.err (!%p1138_p7)
}
 0x5c1   :  { %s1149_s18 = smov 128   ;;  %s1150_s19 = smov 8  }
 0x5c2   :  { %896 = dma.vmem_to_hbm [thread:$0]  %s891_s1, 384, %s1475_s13, [#allocation3], %s1149_s18, %s1149_s18, %s1150_s19  }
 0x5c3   :  { %1142 = dma.done.wait [#allocation3], 384  }
 0x5c4   :  { %1143 = vsyncadd [#allocation3], 4294966912 }
 0x5c5   :  { %900 = vsyncpa [#allocation3], 1 }

</bundles_post_ra>
